<compile_context>
chip_gen: v7x
topology: tpu7x:2x2x1
jax: 0.10.0
libtpu: 0.0.40
codegen_flags: <defaults>
</compile_context>

<pallas_src>
import jax
import jax.numpy as jnp
from jax import lax
from jax.experimental import pallas as pl
from jax.experimental.pallas import tpu as pltpu


# --------------------------------------------------------------------------
# Fused ResidualBlock kernel: one grid step == one batch sample, (C, L) tile
# --------------------------------------------------------------------------
def _residual_block_kernel(x_ref, w1_ref, t1_ref, w2_ref, t2_ref, o_ref):
    C, L = x_ref.shape[1], x_ref.shape[2]
    x = x_ref[0].astype(jnp.float32)                       # (C, L), lanes = L
    zcol = jnp.zeros((C, 1), jnp.float32)

    def conv3(inp, w_ref, t_ref):
        # tap shifts along L with exact zero edges (single zero column, no (L+2) pad copy)
        left = jnp.concatenate([zcol, inp[:, :L - 1]], axis=-1)   # x[:, l-1]
        right = jnp.concatenate([inp[:, 1:], zcol], axis=-1)      # x[:, l+1]
        # 3 accumulated per-tap MXU matmuls; BN scale already folded into w
        acc = jnp.dot(w_ref[0], left, preferred_element_type=jnp.float32)
        acc += jnp.dot(w_ref[1], inp, preferred_element_type=jnp.float32)
        acc += jnp.dot(w_ref[2], right, preferred_element_type=jnp.float32)
        return acc + t_ref[...]                            # (C,1) shift, lane broadcast

    # out = relu(bn1(conv1(x)))
    h = jnp.maximum(conv3(x, w1_ref, t1_ref), 0.0)
    # out = bn2(conv2(out)) + identity; relu
    y = jnp.maximum(conv3(h, w2_ref, t2_ref) + x, 0.0)
    o_ref[0] = y.astype(o_ref.dtype)


def _fold_weights(w_oik, scale):
    """PyTorch (C_out, C_in, K) conv weight -> (K, C_out, C_in) with BN scale folded."""
    w_koi = jnp.transpose(w_oik, (2, 0, 1)).astype(jnp.float32)
    return w_koi * scale.astype(jnp.float32)[None, :, None]


def _vmem_limit_bytes(C, L):
    tile = C * L * 4                         # one (C, L) f32 tile
    weights = 2 * (3 * C * C + C) * 4        # both folded weights + shifts
    # in/out tiles double-buffered + weights (double-buffered once) + ~8 tile-sized
    # f32 temporaries in the body + compiler headroom; cap at 48 MiB (safe on v7x).
    need = 4 * tile + 2 * weights + 8 * tile + (2 << 20)
    return int(min(max(need, 4 << 20), 48 << 20))


def residual_block_forward(x_ncl, p):
    """x_ncl: (B, C, L) PyTorch layout. Returns (B, C, L)."""
    B, C, L = x_ncl.shape
    x = x_ncl.astype(jnp.float32)

    w1 = _fold_weights(p["w1"], p["scale1"])               # (3, C, C)
    w2 = _fold_weights(p["w2"], p["scale2"])
    t1 = p["shift1"].reshape(C, 1).astype(jnp.float32)
    t2 = p["shift2"].reshape(C, 1).astype(jnp.float32)

    return pl.pallas_call(
        _residual_block_kernel,
        out_shape=jax.ShapeDtypeStruct((B, C, L), jnp.float32),
        grid=(B,),
        in_specs=[
            pl.BlockSpec((1, C, L), lambda b: (b, 0, 0)),   # activation: per-sample tile
            pl.BlockSpec((3, C, C), lambda b: (0, 0, 0)),   # weights: constant -> resident
            pl.BlockSpec((C, 1), lambda b: (0, 0)),
            pl.BlockSpec((3, C, C), lambda b: (0, 0, 0)),
            pl.BlockSpec((C, 1), lambda b: (0, 0)),
        ],
        out_specs=pl.BlockSpec((1, C, L), lambda b: (b, 0, 0)),
        compiler_params=pltpu.CompilerParams(
            dimension_semantics=("parallel",),
            vmem_limit_bytes=_vmem_limit_bytes(C, L),
        ),
    )(x, w1, t1, w2, t2)


# --------------------------------------------------------------------------
# Parameters (eval-mode BatchNorm folded into per-channel scale/shift)
# --------------------------------------------------------------------------
def _fold_bn(conv_bias, gamma, beta, mean, var, eps=1e-5):
    scale = gamma / jnp.sqrt(var + eps)
    shift = beta + (conv_bias - mean) * scale
    return scale, shift


def init_params(key, channels):
    ks = jax.random.split(key, 12)
    C = channels

    def bn(k0, k1, k2, k3):
        gamma = 1.0 + 0.1 * jax.random.normal(k0, (C,), jnp.float32)
        beta = 0.1 * jax.random.normal(k1, (C,), jnp.float32)
        mean = 0.1 * jax.random.normal(k2, (C,), jnp.float32)
        var = jax.random.uniform(k3, (C,), jnp.float32, 0.5, 1.5)
        return gamma, beta, mean, var

    # PyTorch Conv1d weight layout: (C_out, C_in, K)
    w1 = 0.1 * jax.random.normal(ks[0], (C, C, 3), jnp.float32)
    b1 = 0.1 * jax.random.normal(ks[1], (C,), jnp.float32)
    w2 = 0.1 * jax.random.normal(ks[2], (C, C, 3), jnp.float32)
    b2 = 0.1 * jax.random.normal(ks[3], (C,), jnp.float32)

    scale1, shift1 = _fold_bn(b1, *bn(ks[4], ks[5], ks[6], ks[7]))
    scale2, shift2 = _fold_bn(b2, *bn(ks[8], ks[9], ks[10], ks[11]))

    # TODO(synk): BatchNorm training-mode batch statistics are not implemented
    # (eval-mode running stats are folded into scale/shift, matching module.eval()).
    return {"w1": w1, "scale1": scale1, "shift1": shift1,
            "w2": w2, "scale2": scale2, "shift2": shift2}


# --------------------------------------------------------------------------
# Pure-JAX reference (same math, high-precision convs) for validation
# --------------------------------------------------------------------------
def residual_block_ref(x_ncl, p):
    x = x_ncl.astype(jnp.float32)

    def conv_bn(inp, w, scale, shift):
        y = lax.conv_general_dilated(
            inp, w, window_strides=(1,), padding=((1, 1),),
            dimension_numbers=("NCH", "OIH", "NCH"),
            precision=lax.Precision.HIGHEST)
        return y * scale[None, :, None] + shift[None, :, None]

    h = jax.nn.relu(conv_bn(x, p["w1"], p["scale1"], p["shift1"]))
    y = conv_bn(h, p["w2"], p["scale2"], p["shift2"]) + x
    return jax.nn.relu(y)


if __name__ == "__main__":
    key = jax.random.PRNGKey(0)
    k_x, k_p = jax.random.split(key)
    B, C, L = 4, 32, 128                      # ResidualBlock(channels=32), lane-dense L
    x = jax.random.normal(k_x, (B, C, L), jnp.float32)     # PyTorch NCL layout
    params = init_params(k_p, C)

    out = residual_block_forward(x, params)
    jax.block_until_ready(out)
    assert out.shape == (B, C, L), out.shape

    ref = residual_block_ref(x, params)
    max_err = float(jnp.max(jnp.abs(out - ref)))
    assert max_err < 2e-2, f"max abs error vs reference: {max_err}"

    print("KERNEL_OK")
</pallas_src>

<mosaic_0001>
module attributes {stable_mosaic.version = 11 : i64} {
  func.func @_residual_block_kernel(%arg0: i32, %arg1: memref<1x32x128xf32, #tpu.memory_space<vmem>>, %arg2: memref<3x32x32xf32, #tpu.memory_space<vmem>>, %arg3: memref<32x1xf32, #tpu.memory_space<vmem>>, %arg4: memref<3x32x32xf32, #tpu.memory_space<vmem>>, %arg5: memref<32x1xf32, #tpu.memory_space<vmem>>, %arg6: memref<1x32x128xf32, #tpu.memory_space<vmem>>) attributes {dimension_semantics = [#tpu.dimension_semantics<parallel>], iteration_bounds = array<i64: 4>, scalar_prefetch = 0 : i64, scratch_operands = 0 : i64, tpu.core_type = #tpu.core_type<tc>, window_params = [{transform_indices = @transform_0, window_bounds = array<i64: 1, 32, 128>}, {pipeline_mode = #tpu.pipeline_mode<synchronous>, transform_indices = @transform_1, window_bounds = array<i64: 3, 32, 32>}, {pipeline_mode = #tpu.pipeline_mode<synchronous>, transform_indices = @transform_2, window_bounds = array<i64: 32, 1>}, {pipeline_mode = #tpu.pipeline_mode<synchronous>, transform_indices = @transform_3, window_bounds = array<i64: 3, 32, 32>}, {pipeline_mode = #tpu.pipeline_mode<synchronous>, transform_indices = @transform_4, window_bounds = array<i64: 32, 1>}, {transform_indices = @transform_5, window_bounds = array<i64: 1, 32, 128>}]} {
    %c0 = arith.constant 0 : index
    %c0_0 = arith.constant 0 : index
    %c0_1 = arith.constant 0 : index
    %0 = vector.load %arg1[%c0, %c0_0, %c0_1] : memref<1x32x128xf32, #tpu.memory_space<vmem>>, vector<1x32x128xf32>
    %1 = vector.shape_cast %0 : vector<1x32x128xf32> to vector<32x128xf32>
    %cst = arith.constant 0.000000e+00 : f32
    %2 = vector.broadcast %cst : f32 to vector<32x1xf32>
    %3 = vector.extract_strided_slice %1 {offsets = [0, 0], sizes = [32, 127], strides = [1, 1]} : vector<32x128xf32> to vector<32x127xf32>
    %4 = tpu.concatenate %2, %3 in 1 : vector<32x1xf32>, vector<32x127xf32> -> vector<32x128xf32>
    %5 = vector.extract_strided_slice %1 {offsets = [0, 1], sizes = [32, 127], strides = [1, 1]} : vector<32x128xf32> to vector<32x127xf32>
    %6 = tpu.concatenate %5, %2 in 1 : vector<32x127xf32>, vector<32x1xf32> -> vector<32x128xf32>
    %c0_2 = arith.constant 0 : index
    %c0_3 = arith.constant 0 : index
    %c0_4 = arith.constant 0 : index
    %7 = vector.load %arg2[%c0_2, %c0_3, %c0_4] : memref<3x32x32xf32, #tpu.memory_space<vmem>>, vector<1x32x32xf32>
    %8 = vector.shape_cast %7 : vector<1x32x32xf32> to vector<32x32xf32>
    %cst_5 = arith.constant dense<0.000000e+00> : vector<32x128xf32>
    %9 = tpu.matmul %8, %4, %cst_5 {dimension_numbers = #tpu.dot_dimension_numbers<[1], [0], [0], [1], [0, 0, 1, 1], [], []>} : vector<32x32xf32>, vector<32x128xf32>, vector<32x128xf32> -> vector<32x128xf32>
    %c1 = arith.constant 1 : index
    %c0_6 = arith.constant 0 : index
    %c0_7 = arith.constant 0 : index
    %10 = vector.load %arg2[%c1, %c0_6, %c0_7] : memref<3x32x32xf32, #tpu.memory_space<vmem>>, vector<1x32x32xf32>
    %11 = vector.shape_cast %10 : vector<1x32x32xf32> to vector<32x32xf32>
    %cst_8 = arith.constant dense<0.000000e+00> : vector<32x128xf32>
    %12 = tpu.matmul %11, %1, %cst_8 {dimension_numbers = #tpu.dot_dimension_numbers<[1], [0], [0], [1], [0, 0, 1, 1], [], []>} : vector<32x32xf32>, vector<32x128xf32>, vector<32x128xf32> -> vector<32x128xf32>
    %13 = arith.addf %9, %12 : vector<32x128xf32>
    %c2 = arith.constant 2 : index
    %c0_9 = arith.constant 0 : index
    %c0_10 = arith.constant 0 : index
    %14 = vector.load %arg2[%c2, %c0_9, %c0_10] : memref<3x32x32xf32, #tpu.memory_space<vmem>>, vector<1x32x32xf32>
    %15 = vector.shape_cast %14 : vector<1x32x32xf32> to vector<32x32xf32>
    %cst_11 = arith.constant dense<0.000000e+00> : vector<32x128xf32>
    %16 = tpu.matmul %15, %6, %cst_11 {dimension_numbers = #tpu.dot_dimension_numbers<[1], [0], [0], [1], [0, 0, 1, 1], [], []>} : vector<32x32xf32>, vector<32x128xf32>, vector<32x128xf32> -> vector<32x128xf32>
    %17 = arith.addf %13, %16 : vector<32x128xf32>
    %c0_12 = arith.constant 0 : index
    %c0_13 = arith.constant 0 : index
    %18 = vector.load %arg3[%c0_12, %c0_13] : memref<32x1xf32, #tpu.memory_space<vmem>>, vector<32x1xf32>
    %19 = vector.broadcast %18 : vector<32x1xf32> to vector<32x128xf32>
    %20 = arith.addf %17, %19 : vector<32x128xf32>
    %cst_14 = arith.constant 0.000000e+00 : f32
    %21 = vector.broadcast %cst_14 : f32 to vector<32x128xf32>
    %22 = arith.maximumf %20, %21 : vector<32x128xf32>
    %23 = vector.extract_strided_slice %22 {offsets = [0, 0], sizes = [32, 127], strides = [1, 1]} : vector<32x128xf32> to vector<32x127xf32>
    %24 = tpu.concatenate %2, %23 in 1 : vector<32x1xf32>, vector<32x127xf32> -> vector<32x128xf32>
    %25 = vector.extract_strided_slice %22 {offsets = [0, 1], sizes = [32, 127], strides = [1, 1]} : vector<32x128xf32> to vector<32x127xf32>
    %26 = tpu.concatenate %25, %2 in 1 : vector<32x127xf32>, vector<32x1xf32> -> vector<32x128xf32>
    %c0_15 = arith.constant 0 : index
    %c0_16 = arith.constant 0 : index
    %c0_17 = arith.constant 0 : index
    %27 = vector.load %arg4[%c0_15, %c0_16, %c0_17] : memref<3x32x32xf32, #tpu.memory_space<vmem>>, vector<1x32x32xf32>
    %28 = vector.shape_cast %27 : vector<1x32x32xf32> to vector<32x32xf32>
    %cst_18 = arith.constant dense<0.000000e+00> : vector<32x128xf32>
    %29 = tpu.matmul %28, %24, %cst_18 {dimension_numbers = #tpu.dot_dimension_numbers<[1], [0], [0], [1], [0, 0, 1, 1], [], []>} : vector<32x32xf32>, vector<32x128xf32>, vector<32x128xf32> -> vector<32x128xf32>
    %c1_19 = arith.constant 1 : index
    %c0_20 = arith.constant 0 : index
    %c0_21 = arith.constant 0 : index
    %30 = vector.load %arg4[%c1_19, %c0_20, %c0_21] : memref<3x32x32xf32, #tpu.memory_space<vmem>>, vector<1x32x32xf32>
    %31 = vector.shape_cast %30 : vector<1x32x32xf32> to vector<32x32xf32>
    %cst_22 = arith.constant dense<0.000000e+00> : vector<32x128xf32>
    %32 = tpu.matmul %31, %22, %cst_22 {dimension_numbers = #tpu.dot_dimension_numbers<[1], [0], [0], [1], [0, 0, 1, 1], [], []>} : vector<32x32xf32>, vector<32x128xf32>, vector<32x128xf32> -> vector<32x128xf32>
    %33 = arith.addf %29, %32 : vector<32x128xf32>
    %c2_23 = arith.constant 2 : index
    %c0_24 = arith.constant 0 : index
    %c0_25 = arith.constant 0 : index
    %34 = vector.load %arg4[%c2_23, %c0_24, %c0_25] : memref<3x32x32xf32, #tpu.memory_space<vmem>>, vector<1x32x32xf32>
    %35 = vector.shape_cast %34 : vector<1x32x32xf32> to vector<32x32xf32>
    %cst_26 = arith.constant dense<0.000000e+00> : vector<32x128xf32>
    %36 = tpu.matmul %35, %26, %cst_26 {dimension_numbers = #tpu.dot_dimension_numbers<[1], [0], [0], [1], [0, 0, 1, 1], [], []>} : vector<32x32xf32>, vector<32x128xf32>, vector<32x128xf32> -> vector<32x128xf32>
    %37 = arith.addf %33, %36 : vector<32x128xf32>
    %c0_27 = arith.constant 0 : index
    %c0_28 = arith.constant 0 : index
    %38 = vector.load %arg5[%c0_27, %c0_28] : memref<32x1xf32, #tpu.memory_space<vmem>>, vector<32x1xf32>
    %39 = vector.broadcast %38 : vector<32x1xf32> to vector<32x128xf32>
    %40 = arith.addf %37, %39 : vector<32x128xf32>
    %41 = arith.addf %40, %1 : vector<32x128xf32>
    %cst_29 = arith.constant 0.000000e+00 : f32
    %42 = vector.broadcast %cst_29 : f32 to vector<32x128xf32>
    %43 = arith.maximumf %41, %42 : vector<32x128xf32>
    %c0_30 = arith.constant 0 : index
    %c0_31 = arith.constant 0 : index
    %c0_32 = arith.constant 0 : index
    %44 = vector.load %arg6[%c0_30, %c0_31, %c0_32] : memref<1x32x128xf32, #tpu.memory_space<vmem>>, vector<1x32x128xf32>
    %45 = vector.shape_cast %44 : vector<1x32x128xf32> to vector<32x128xf32>
    %46 = vector.shape_cast %43 : vector<32x128xf32> to vector<1x32x128xf32>
    tpu.vector_store %arg6[%c0_30, %c0_31, %c0_32], %46 {strides = array<i32>} : memref<1x32x128xf32, #tpu.memory_space<vmem>>, vector<1x32x128xf32>,
    return
  }
  func.func @transform_0(%arg0: i32) -> (i32, i32, i32) {
    %c0_i32 = arith.constant 0 : i32
    %c0_i32_0 = arith.constant 0 : i32
    %c0_i32_1 = arith.constant 0 : i32
    return %arg0, %c0_i32, %c0_i32_0 : i32, i32, i32
  }
  func.func @transform_1(%arg0: i32) -> (i32, i32, i32) {
    %c0_i32 = arith.constant 0 : i32
    %c0_i32_0 = arith.constant 0 : i32
    %c0_i32_1 = arith.constant 0 : i32
    %c0_i32_2 = arith.constant 0 : i32
    return %c0_i32, %c0_i32_0, %c0_i32_1 : i32, i32, i32
  }
  func.func @transform_2(%arg0: i32) -> (i32, i32) {
    %c0_i32 = arith.constant 0 : i32
    %c0_i32_0 = arith.constant 0 : i32
    %c0_i32_1 = arith.constant 0 : i32
    return %c0_i32, %c0_i32_0 : i32, i32
  }
  func.func @transform_3(%arg0: i32) -> (i32, i32, i32) {
    %c0_i32 = arith.constant 0 : i32
    %c0_i32_0 = arith.constant 0 : i32
    %c0_i32_1 = arith.constant 0 : i32
    %c0_i32_2 = arith.constant 0 : i32
    return %c0_i32, %c0_i32_0, %c0_i32_1 : i32, i32, i32
  }
  func.func @transform_4(%arg0: i32) -> (i32, i32) {
    %c0_i32 = arith.constant 0 : i32
    %c0_i32_0 = arith.constant 0 : i32
    %c0_i32_1 = arith.constant 0 : i32
    return %c0_i32, %c0_i32_0 : i32, i32
  }
  func.func @transform_5(%arg0: i32) -> (i32, i32, i32) {
    %c0_i32 = arith.constant 0 : i32
    %c0_i32_0 = arith.constant 0 : i32
    %c0_i32_1 = arith.constant 0 : i32
    return %arg0, %c0_i32, %c0_i32_0 : i32, i32, i32
  }
}

</mosaic_0001>

<bundles_post_ra>
// kernel: tpu_custom_call.1
= control target key start
LH: loop header
LB: loop body
LE: loop exit
PB: predicated region body
PF: predicated region fallthrough
CT: control target
= control target key end

     0   :  { %10 = vsyncpa [#allocation3], 0  ;;  %s2096_s0 = inlined_call_operand.hbm [shape: f32[4,32,128], index: 0, kind: input, shape index: {}]   ;;  %s2097_s1 = inlined_call_operand.hbm [shape: f32[3,32,32], index: 1, kind: input, shape index: {}]   ;;  %s2098_s2 = inlined_call_operand.vmem [shape: f32[32,1], index: 2, kind: input, shape index: {}]   ;;  %s2099_s3 = inlined_call_operand.hbm [shape: f32[3,32,32], index: 3, kind: input, shape index: {}]   ;;  %s2100_s4 = inlined_call_operand.vmem [shape: f32[32,1], index: 4, kind: input, shape index: {}]   ;;  %s2101_s5 = inlined_call_operand.hbm [shape: f32[4,32,128], index: 5, kind: output, shape index: {}]  }
   0x1   :  { %12 = vsyncpa [#allocation3 + $0x1], 0 }
   0x2   :  { %13 = vsyncpa [#allocation6], 0 }
   0x3   :  { %14 = vsyncpa [#allocation4], 0 }
   0x4   :  { %16 = vsyncpa [#allocation4 + $0x1], 0  ;;  %s1742_s18 = smov 0   ;;  %s1744_s19 = smov 0  }
   0x5   :  { %s1746_s20 = smov 0   ;;  %s1748_s21 = smov 0  }
   0x6 LB: > { %s1763_s22 = sadd.s32 4294967295, %s1699_s21   ;;  %s1147_s23 = sadd.s32 4294967294, %s1699_s21   ;;  %s1699_s21 = sphi %s1748_s21, %s2124_s21   ;;  %s1695_s20 = sphi %s1746_s20, %s2123_s20   ;;  %s1691_s19 = sphi %s1744_s19, %s2122_s19   ;;  %s1687_s18 = sphi %s1742_s18, %s2121_s18  }
   0x7   : > { %p42_p0 = scmp.ne.s32.totalorder %s1691_s19, %s1687_s18  ;;  %p2102_p1 = scmp.eq.s32.totalorder %s1763_s22, 0 }
   0x8   : > { %p156_p3 = scmp.eq.s32.totalorder %s1147_s23, 3  ;;  %p1148_p5 = scmp.ge.s32.totalorder %s1699_s21, 1 }
   0x9   : > { %p1772_p4 = por %p2102_p1, %p42_p0  ;;  %p163_p7 = scmp.lt.s32.totalorder %s1699_s21, 5 }
   0xa   : > { %p1777_p6 = por %p156_p3, %p42_p0  ;;  %s1701_s27 = smov [#allocation5]  }
   0xb   : > { %s2105_s24 = scalar_select %p1772_p4, 1, 0 }
   0xc   : > { %s2106_s25 = scalar_select %p1777_p6, 1, 0 }
   0xd   : > { %p1782_p8 = pnand %p1148_p5, %p163_p7  ;;  %s175_s28 = sshll.u32 %s1701_s27, 4  ;;  %s176_s28 = int_to_ptr.vmem [resolvable:$true] %s175_s28 }
   0xe   : > { %s1702_s30 = smov [#allocation7]   ;;  %s1543_s9 = scalar_lea.hbm %s2097_s1, 1536 }
   0xf   : > { %s2107_s26 = scalar_select %p1782_p8, 1, 0 }
  0x10   : > { %p1439_p9 = pneg %p1782_p8  ;;  %s191_s6 = sshll.u32 %s1702_s30, 4  ;;  %s1794_s6 = int_to_ptr.vmem [resolvable:$true] %s191_s6 }
  0x11   : > { %p1544_p11 = scmp.ne.s32.totalorder %s2097_s1, %s1543_s9  ;;  %p1550_p3 = scmp.lt.u32.totalorder %s1543_s9, %s2097_s1 }
  0x12   : > { %p1790_p10 = pnand %p1439_p9, %p2102_p1 }
  0x14   : > { %p1545_p12 = pneg %p1790_p10 }
  0x16   : > { %p1546_p13 = pnand %p1545_p12, %p1544_p11 }
  0x18   : > { %p1547_p0 = pneg %p1546_p13 }
  0x1a   : > { %p1552_p5 = pnand %p1550_p3, %p1547_p0 }
  0x1c   : > { %1555 = shalt.err (!%p1552_p5)
}
  0x1d   : > { %s1556_s14 = scalar_lea.vmem %s176_s28, 1536  ;;  %p1564_p2 = scmp.lt.s32.totalorder %s176_s28, %s176_s28 }
  0x1e   : > { %p1557_p7 = scmp.ne.s32.totalorder %s176_s28, %s1556_s14  ;;  %p1565_p6 = scmp.lt.s32.totalorder %s1556_s14, %s1556_s14 }
  0x20   : > { %p1559_p9 = pnand %p1557_p7, %p1545_p12  ;;  %p1566_p4 = por %p1565_p6, %p1564_p2 }
  0x22   : > { %p1560_p1 = pneg %p1559_p9 }
  0x24   : > { %p1567_p8 = pnand %p1566_p4, %p1560_p1 }
  0x26   : > { %1570 = shalt.err (!%p1567_p8)
}
  0x27   : > { %s1703_s15 = smov 128   ;;  %s1704_s16 = smov 8  }
  0x28   : > { %1442 = dma.hbm_to_vmem [thread:$0]  (!%p1790_p10), %s2097_s1, 1536, %s176_s28, [#allocation6], %s1703_s15, %s1703_s15, %s1704_s16  }
  0x29   : > { %s1571_s7 = scalar_lea.hbm %s2099_s3, 1536 }
  0x2a   : > { %p1572_p1 = scmp.ne.s32.totalorder %s2099_s3, %s1571_s7  ;;  %p1578_p6 = scmp.lt.u32.totalorder %s1571_s7, %s2099_s3 }
  0x2c   : > { %p1574_p2 = pnand %p1572_p1, %p1545_p12 }
  0x2e   : > { %p1575_p4 = pneg %p1574_p2 }
  0x30   : > { %p1580_p8 = pnand %p1578_p6, %p1575_p4 }
  0x32   : > { %1583 = shalt.err (!%p1580_p8)
}
  0x33   : > { %s1584_s28 = scalar_lea.vmem %s1794_s6, 1536  ;;  %p1592_p3 = scmp.lt.s32.totalorder %s1794_s6, %s1794_s6 }
  0x34   : > { %p1585_p11 = scmp.ne.s32.totalorder %s1794_s6, %s1584_s28  ;;  %p1593_p5 = scmp.lt.s32.totalorder %s1584_s28, %s1584_s28 }
  0x36   : > { %p1587_p13 = pnand %p1585_p11, %p1545_p12  ;;  %p1594_p7 = por %p1593_p5, %p1592_p3 }
  0x38   : > { %p1588_p0 = pneg %p1587_p13 }
  0x3a   : > { %p1595_p9 = pnand %p1594_p7, %p1588_p0 }
  0x3c   : > { %1598 = shalt.err (!%p1595_p9)
}
  0x3d   : > { %1445 = dma.hbm_to_vmem [thread:$0]  (!%p1790_p10), %s2099_s3, 1536, %s1794_s6, [#allocation6], %s1703_s15, %s1703_s15, %s1704_s16  }
  0x3e   : > { %s1850_s29 = sadd.s32 1, %s1699_s21   ;;  %s29_s14 = sadd.s32 1, %s1695_s20 }
  0x3f   : > { %s26_s17 = ssub.s32 %s1699_s21, %s1850_s29  ;;  %p36_p12 = scmp.ne.s32.totalorder %s1695_s20, %s1691_s19 }
  0x40   : > { %p27_p1 = scmp.eq.s32.totalorder %s26_s17, 0  ;;  %p37_p2 = scmp.eq.s32.totalorder %s1699_s21, 0 }
  0x41   : > { %p2109_p4 = scmp.eq.s32.totalorder %s1763_s22, 3  ;;  %p1456_p8 = scmp.lt.s32.totalorder %s1699_s21, 4 }
  0x42   : > { %s1866_s27 = scalar_select %p27_p1, %s1695_s20, %s29_s14  }
  0x43   : > { %p1860_p6 = por %p2109_p4, %p36_p12  ;;  %p38_p11 = por %p37_p2, %p36_p12 }
  0x44   : > { %s208_s30 = sand.u32 1, %s1695_s20   ;;  %s1213_s6 = sshll.u32 %s1699_s21, 9 }
  0x45   : > { %s1152_s7 = sshll.u32 %s208_s30, 5  ;;  %s1873_s10 = scalar_lea.hbm %s2096_s0, %s1213_s6 }
  0x46   : > { %s212_s11 = scalar_lea.vmem [#allocation2], %s1152_s7  ;;  %p1877_p10 = pnand %p1456_p8, %p38_p11 }
  0x47   : > { %s219_s28 = sshll.u32 %s212_s11, 4  ;;  %s1881_s13 = scalar_lea.sflag [#allocation3], %s208_s30  ;;  %s1875_s28 = int_to_ptr.vmem [resolvable:$true] %s219_s28 }
  0x48   : > { %s1599_s14 = scalar_lea.hbm %s1873_s10, 512  ;;  %p1601_p0 = pneg %p1877_p10 }
  0x49   : > { %p1600_p13 = scmp.ne.s32.totalorder %s1873_s10, %s1599_s14  ;;  %s1604_s6 = scalar_lea.hbm %s2096_s0, 2048 }
  0x4a   : > { %p1605_p7 = scmp.lt.u32.totalorder %s1873_s10, %s2096_s0  ;;  %p1606_p9 = scmp.lt.u32.totalorder %s1604_s6, %s1599_s14 }
  0x4b   : > { %p1602_p3 = pnand %p1601_p0, %p1600_p13  ;;  %p1608_p1 = scmp.lt.u32.totalorder %s1599_s14, %s1873_s10 }
  0x4c   : > { %p1607_p12 = por %p1606_p9, %p1605_p7 }
  0x4d   : > { %p1603_p5 = pneg %p1602_p3 }
  0x4e   : > { %p1609_p2 = por %p1608_p1, %p1607_p12 }
  0x50   : > { %p1610_p4 = pnand %p1609_p2, %p1603_p5 }
  0x52   : > { %1613 = shalt.err (!%p1610_p4)
}
  0x53   : > { %s1614_s30 = scalar_lea.vmem %s1875_s28, 512  ;;  %s1705_s11 = smov [#allocation2]  }
  0x54   : > { %p1615_p8 = scmp.ne.s32.totalorder %s1875_s28, %s1614_s30  ;;  %s1619_s17 = sshll.u32 %s1705_s11, 4  ;;  %s1620_s17 = int_to_ptr.vmem [resolvable:$false] %s1619_s17 }
  0x55   : > { %s1621_s7 = scalar_lea.vmem %s1620_s17, 1024  ;;  %p1622_p3 = scmp.lt.s32.totalorder %s1875_s28, %s1620_s17 }
  0x56   : > { %p1617_p11 = pnand %p1615_p8, %p1601_p0  ;;  %p1623_p7 = scmp.lt.s32.totalorder %s1621_s7, %s1614_s30 }
  0x58   : > { %p1618_p13 = pneg %p1617_p11  ;;  %p1624_p9 = por %p1623_p7, %p1622_p3 }
  0x5a   : > { %p1625_p12 = pnand %p1624_p9, %p1618_p13 }
  0x5c   : > { %1628 = shalt.err (!%p1625_p12)
}
  0x5d   : > { %1449 = dma.hbm_to_vmem [thread:$0]  (!%p1877_p10), %s1873_s10, 512, %s1875_s28, %s1881_s13, %s1703_s15, %s1703_s15, %s1704_s16  }
  0x5e   : > { %p2112_p0 = scmp.ne.s32.totalorder %s2107_s26, 0 }
  0x5f   : > { %s1915_s14 = sand.u32 (!%p2112_p0), 1, %s1691_s19   ;;  %p2113_p5 = scmp.ne.s32.totalorder (!%p2112_p0), %s2105_s24, 0 }
  0x60   : > { %231 = sbr.rel (%p2112_p0) target bundleno = 837 (0x345), region = 40  ;;  %s1156_s6 = sshll.u32 (!%p2112_p0), %s1915_s14, 5 }
  0x61   : > { %s234_s8 = scalar_lea.sflag (!%p2112_p0), [#allocation3], %s1915_s14  ;;  %s237_s12 = scalar_lea.vmem (!%p2112_p0), [#allocation2], %s1156_s6 }
  0x67   : > { %1674 = dma.done.wait (%p2113_p5), %s234_s8, 512  }
  0x68   : > { %1676 = vsyncadd (%p2113_p5), %s234_s8, 4294966784  ;;  %p2114_p10 = scmp.eq.s32.totalorder %s1763_s22, 0 }
  0x6a   : > { %1678 = dma.done.wait (%p2114_p10), [#allocation6], 3072   ;;  %p2115_p1 = pmov %p2114_p10 }
  0x6b   : > { %vm323_vm0 = vcmask 261120   ;;  %v1929_v0 = vld [vmem:[%s237_s12] sm:$0xff]  ;;  %v1931_v1 = vld [vmem:[%s237_s12 + $0x8] sm:$0xff]  ;;  %v1933_v2 = vld [vmem:[%s237_s12 + $0x10] sm:$0xff]  ;;  %s1706_s24 = smov 1   ;;  %s1707_s26 = smov 127  }
  0x6c   : > { %1680 = vsyncadd (%p2115_p1), [#allocation6], 4294964224  ;;  %v1501_v3 = vpack.i.bf16 %v1931_v1, %v1929_v0  ;;  %v1937_v4 = vld [vmem:[%s237_s12 + $0x18] sm:$0xff]  ;;  %v1347_v5 = vpack.c.bf16 %v1931_v1, %v1929_v0  ;;  %v319_v6 = vld [vmem:[#allocation5 + $0x20] sm:$0xff]  ;;  %v1708_v15 = vmov 0   ;;  %vm292_vm1 = vcmask 7168  }
  0x6d   : > { %v1351_v7 = vpack.c.bf16 %v1937_v4, %v1933_v2  ;;  %1271 = vmatprep.mubr.msk.f32.mxu0 %vm323_vm0, %v319_v6  ;;  %v1506_v8 = vpack.i.bf16 %v1937_v4, %v1933_v2  ;;  %v320_v9 = vld [vmem:[#allocation5 + $0x28] sm:$0xff]  ;;  %v321_v10 = vld [vmem:[#allocation5 + $0x30] sm:$0xff]  ;;  %v322_v11 = vld [vmem:[#allocation5 + $0x38] sm:$0xff]  ;;  %1522 = vset.pattern.permute.xlu1 %v1708_v15  ;;  %vm309_vm4 = vcmask 1039360   ;;  %s1214_s13 = sshll.u32 %s1763_s22, 9  ;;  %s1042_s22 = scalar_lea.sflag [#allocation4], %s1915_s14 }
  0x6e   : > { %1502 = vrot.lane.b32.xlu0 %v1501_v3, %s1706_s24  ;;  %1512 = vrot.lane.b32.xlu1 %v1501_v3, %s1707_s26  ;;  %v314_v12 = vld [vmem:[#allocation5] sm:$0xff]  ;;  %v625_v13 = vld [vmem:[%s2098_s2 + $0x8] sm:$0xff]  ;;  %v626_v16 = vld [vmem:[%s2098_s2 + $0x10] sm:$0xff]  ;;  %s2053_s30 = scalar_lea.hbm %s2101_s5, %s1214_s13  ;;  %s1709_s17 = smov [#allocation8]  }
  0x6f   : > { %1348 = vmatprep.subr.bf16.mxu0 %v1347_v5  ;;  %v624_v14 = vld [vmem:[%s2098_s2] sm:$0xff]  ;;  %1521 = vset.pattern.permute.xlu0 %v1708_v15  ;;  %v627_v17 = vld [vmem:[%s2098_s2 + $0x18] sm:$0xff]  ;;  %vm1164_vm2 = vmneg %vm292_vm1  ;;  %s1633_s7 = sshll.u32 %s1709_s17, 4  ;;  %s1634_s7 = int_to_ptr.vmem [resolvable:$false] %s1633_s7 }
  0x70   : > { %1350 = vmatpush3.bf16.msra.mxu0 %v1347_v5  ;;  %vm1966_vm3 = vmpackc.low %vm1164_vm2, %vm1164_vm2  ;;  %v315_v35 = vld [vmem:[#allocation5 + $0x8] sm:$0xff]  ;;  %v316_v37 = vld [vmem:[#allocation5 + $0x10] sm:$0xff]  ;;  %s1635_s8 = scalar_lea.vmem %s1634_s7, 1024 }
  0x71   : > { %1352 = vmatprep.subr.bf16.mxu0 %v1351_v7  ;;  %vm1974_vm5 = vmpackc.low %vm309_vm4, %vm309_vm4  ;;  %v317_v38 = vld [vmem:[#allocation5 + $0x18] sm:$0xff]  ;;  %v519_v39 = vld [vmem:[#allocation5 + $0x40] sm:$0xff] }
  0x72   : > { %1507 = vrot.lane.b32.xlu0 %v1506_v8, %s1706_s24  ;;  %1517 = vrot.lane.b32.xlu1 %v1506_v8, %s1707_s26  ;;  %v520_v40 = vld [vmem:[#allocation5 + $0x48] sm:$0xff]  ;;  %v521_v41 = vld [vmem:[#allocation5 + $0x50] sm:$0xff]  ;;  %v522_v42 = vld [vmem:[#allocation5 + $0x58] sm:$0xff] }
  0x73   : > { %v697_v43 = vld [vmem:[#allocation7 + $0x20] sm:$0xff]  ;;  %v698_v5 = vld [vmem:[#allocation7 + $0x28] sm:$0xff]  ;;  %v699_v6 = vld [vmem:[#allocation7 + $0x30] sm:$0xff] }
  0x74   : > { %1354 = vmatpush3.bf16.msra.mxu0 %v1351_v7  ;;  %1313 = vmatprep.mubr.msk.f32.mxu1 %vm323_vm0, %v697_v43  ;;  %v1001_v3 = vld [vmem:[%s2100_s4] sm:$0xff]  ;;  %v1003_v7 = vld [vmem:[%s2100_s4 + $0x10] sm:$0xff]  ;;  %v1002_v8 = vld [vmem:[%s2100_s4 + $0x8] sm:$0xff] }
  0x75   : > { %v897_v22 = vld [vmem:[#allocation7 + $0x48] sm:$0xff] }
  0x76   : > { %635 = vperm.xlu1 %1522, %v625_v13   ;;  %630 = vperm.xlu0 %1521, %v624_v14  }
  0x77   : > { %1272 = vmatmul.mubr.msk.f32.vlgmr.msra.gmra.mrb[0].mxu0 %vm323_vm0, %v320_v9  ;;  %v700_v9 = vld [vmem:[#allocation7 + $0x38] sm:$0xff] }
  0x78   : > { %1274 = vmatprep.mubr.msk.f32.mxu0 %vm323_vm0, %v321_v10  ;;  %v692_v10 = vld [vmem:[#allocation7] sm:$0xff] }
  0x7a   : > { %640 = vperm.xlu1 %1522, %v626_v16   ;;  %645 = vperm.xlu0 %1521, %v627_v17  }
  0x7b   : > { %1275 = vmatmul.mubr.msk.f32.gmra.mrb[2].mxu0 %vm323_vm0, %v322_v11  ;;  %v1004_v11 = vld [vmem:[%s2100_s4 + $0x18] sm:$0xff] }
  0x7c   : > { %1285 = vmatprep.mubr.msk.f32.mxu0 %vm323_vm0, %v314_v12 }
  0xe0   : > { %v1503_v18 = vpop.permute.xlu0 %1502  ;;  %v1513_v19 = vpop.permute.xlu1 %1512 }
  0xe1   : > { %v1505_v20 = vunpack.i.h.bf16 %v1503_v18  ;;  %v1504_v21 = vunpack.i.l.bf16 %v1503_v18  ;;  %v1515_v24 = vunpack.i.h.bf16 %v1513_v19  ;;  %v1514_v25 = vunpack.i.l.bf16 %v1513_v19 }
  0xe3   : > { %v1355_v23 = vpack.c.bf16 %v1505_v20, %v1504_v21  ;;  %v1367_v31 = vpack.c.bf16 %v1515_v24, %v1514_v25 }
  0xe4   : > { %v1508_v26 = vpop.permute.xlu0 %1507  ;;  %v1518_v27 = vpop.permute.xlu1 %1517 }
  0xe5   : > { %v1510_v28 = vunpack.i.h.bf16 %v1508_v26  ;;  %v1509_v29 = vunpack.i.l.bf16 %v1508_v26  ;;  %1357 = vmatprep.subr.msk.bf16.mxu0 %vm1966_vm3, %v1355_v23  ;;  %v1520_v32 = vunpack.i.h.bf16 %v1518_v27  ;;  %v1519_v33 = vunpack.i.l.bf16 %v1518_v27 }
  0xe6   : > { %1360 = vmatpush3.bf16.msk.msra.mxu0 %vm1966_vm3, %v1355_v23 }
  0xe7   : > { %v1361_v30 = vpack.c.bf16 %v1510_v28, %v1509_v29  ;;  %v1373_v36 = vpack.c.bf16 %v1520_v32, %v1519_v33  ;;  %v693_v28 = vld [vmem:[#allocation7 + $0x8] sm:$0xff]  ;;  %v694_v29 = vld [vmem:[#allocation7 + $0x10] sm:$0xff]  ;;  %v896_v32 = vld [vmem:[#allocation7 + $0x40] sm:$0xff] }
  0xe8   : > { %v898_v33 = vld [vmem:[#allocation7 + $0x50] sm:$0xff] }
  0xe9   : > { %1363 = vmatprep.subr.msk.bf16.mxu0 %vm1966_vm3, %v1361_v30 }
  0xea   : > { %1366 = vmatpush3.bf16.msk.msra.mxu0 %vm1966_vm3, %v1361_v30 }
  0xeb   : > { %1369 = vmatprep.subr.msk.bf16.mxu0 %vm1974_vm5, %v1367_v31 }
  0xed   : > { %1286 = vmatmul.mubr.msk.f32.vlgmr.msra.gmra.mrb[0].mxu0 %vm323_vm0, %v315_v35  ;;  %v899_v35 = vld [vmem:[#allocation7 + $0x58] sm:$0xff] }
  0xee   : > { %1372 = vmatpush3.bf16.msk.msra.mxu0 %vm1974_vm5, %v1367_v31  ;;  %1288 = vmatprep.mubr.msk.f32.mxu0 %vm323_vm0, %v316_v37  ;;  %v695_v31 = vld [vmem:[#allocation7 + $0x18] sm:$0xff] }
  0xef   : > { %1375 = vmatprep.subr.msk.bf16.mxu0 %vm1974_vm5, %v1373_v36 }
  0xf1   : > { %1289 = vmatmul.mubr.msk.f32.gmra.mrb[2].mxu0 %vm323_vm0, %v317_v38 }
  0xf2   : > { %1378 = vmatpush3.bf16.msk.msra.mxu0 %vm1974_vm5, %v1373_v36  ;;  %1299 = vmatprep.mubr.msk.f32.mxu0 %vm323_vm0, %v519_v39 }
  0xf5   : > { %1300 = vmatmul.mubr.msk.f32.vlgmr.msra.gmra.mrb[0].mxu0 %vm323_vm0, %v520_v40  ;;  %v631_v44 = vpop.permute.xlu0 %630  ;;  %v636_v45 = vpop.permute.xlu1 %635 }
  0xf6   : > { %1302 = vmatprep.mubr.msk.f32.mxu0 %vm323_vm0, %v521_v41 }
  0xf9   : > { %1303 = vmatmul.mubr.msk.f32.gmra.mrb[2].mxu0 %vm323_vm0, %v522_v42  ;;  %v646_v51 = vpop.permute.xlu0 %645  ;;  %v641_v54 = vpop.permute.xlu1 %640 }
 0x1c8   : > { %v1301_v46 = vpop.f32.mrb[0].mxu0 }
 0x1c9   : > { %v649_v47 = vadd.f32 %v1301_v46, %v636_v45  ;;  %v601_v48 = vpop.f32.mrb[1].mxu0 }
 0x1ca   : > { %v648_v49 = vadd.f32 %v631_v44, %v601_v48 }
 0x1cb   : > { %v653_v50 = vmax.f32 %v649_v47, 0.0 }
 0x1cc   : > { %v652_v52 = vmax.f32 %v648_v49, 0.0  ;;  %v1304_v53 = vpop.f32.mrb[2].mxu0 }
 0x1cd   : > { %v651_v55 = vadd.f32 %v1304_v53, %v646_v51  ;;  %v611_v56 = vpop.f32.mrb[3].mxu0 }
 0x1ce   : > { %v650_v57 = vadd.f32 %v641_v54, %v611_v56  ;;  %v1523_v58 = vpack.i.bf16 %v653_v50, %v652_v52  ;;  %v1379_v59 = vpack.c.bf16 %v653_v50, %v652_v52 }
 0x1cf   : > { %v655_v60 = vmax.f32 %v651_v55, 0.0 }
 0x1d0   : > { %v654_v61 = vmax.f32 %v650_v57, 0.0  ;;  %1524 = vrot.lane.b32.xlu1 %v1523_v58, %s1706_s24  ;;  %1380 = vmatprep.subr.bf16.mxu1 %v1379_v59 }
 0x1d1   : > { %1382 = vmatpush3.bf16.msra.mxu1 %v1379_v59 }
 0x1d2   : > { %v1528_v62 = vpack.i.bf16 %v655_v60, %v654_v61  ;;  %v1383_v63 = vpack.c.bf16 %v655_v60, %v654_v61 }
 0x1d4   : > { %1534 = vrot.lane.b32.xlu1 %v1523_v58, %s1707_s26  ;;  %1529 = vrot.lane.b32.xlu0 %v1528_v62, %s1706_s24 }
 0x1d5   : > { %1384 = vmatprep.subr.bf16.mxu1 %v1383_v63 }
 0x1d6   : > { %1386 = vmatpush3.bf16.msra.mxu1 %v1383_v63 }
 0x1d8   : > { %1007 = vperm.xlu1 %1522, %v1001_v3   ;;  %1539 = vrot.lane.b32.xlu0 %v1528_v62, %s1707_s26  ;;  %s271_s26 = scalar_lea.vmem [#allocation8], %s1156_s6 }
 0x1d9   : > { %1314 = vmatmul.mubr.msk.f32.vlgmr.msra.gmra.mrb[0].mxu1 %vm323_vm0, %v698_v5  ;;  %s1055_s28 = sshll.u32 %s271_s26, 4  ;;  %s2047_s28 = int_to_ptr.vmem [resolvable:$true] %s1055_s28 }
 0x1da   : > { %1316 = vmatprep.mubr.msk.f32.mxu1 %vm323_vm0, %v699_v6  ;;  %s1629_s11 = scalar_lea.vmem %s2047_s28, 512  ;;  %p1636_p11 = scmp.lt.s32.totalorder %s2047_s28, %s1634_s7 }
 0x1db   : > { %p1630_p2 = scmp.ne.s32.totalorder %s2047_s28, %s1629_s11  ;;  %p1637_p13 = scmp.lt.s32.totalorder %s1635_s8, %s1629_s11 }
 0x1dc   : > { %1017 = vperm.xlu1 %1522, %v1003_v7   ;;  %1012 = vperm.xlu0 %1521, %v1002_v8  }
 0x1dd   : > { %1317 = vmatmul.mubr.msk.f32.gmra.mrb[2].mxu1 %vm323_vm0, %v700_v9  ;;  %p1631_p4 = pnand %p1630_p2, %p1860_p6  ;;  %p1638_p3 = por %p1637_p13, %p1636_p11 }
 0x1de   : > { %1327 = vmatprep.mubr.msk.f32.mxu1 %vm323_vm0, %v692_v10 }
 0x1df   : > { %p1632_p8 = pneg %p1631_p4 }
 0x1e0   : > { %1022 = vperm.xlu0 %1521, %v1004_v11  }
 0x1e1   : > { %p1639_p7 = pnand %p1638_p3, %p1632_p8 }
 0x242   : > { %v1525_v12 = vpop.permute.xlu1 %1524 }
 0x243   : > { %v1527_v13 = vunpack.i.h.bf16 %v1525_v12  ;;  %v1526_v14 = vunpack.i.l.bf16 %v1525_v12 }
 0x245   : > { %v1387_v15 = vpack.c.bf16 %v1527_v13, %v1526_v14 }
 0x246   : > { %v1535_v16 = vpop.permute.xlu1 %1534  ;;  %v1530_v17 = vpop.permute.xlu0 %1529 }
 0x247   : > { %v1537_v18 = vunpack.i.h.bf16 %v1535_v16  ;;  %v1536_v19 = vunpack.i.l.bf16 %v1535_v16  ;;  %v1532_v20 = vunpack.i.h.bf16 %v1530_v17  ;;  %v1531_v21 = vunpack.i.l.bf16 %v1530_v17  ;;  %1389 = vmatprep.subr.msk.bf16.mxu1 %vm1966_vm3, %v1387_v15 }
 0x248   : > { %1392 = vmatpush3.bf16.msk.msra.mxu1 %vm1966_vm3, %v1387_v15 }
 0x249   : > { %v1393_v23 = vpack.c.bf16 %v1532_v20, %v1531_v21  ;;  %v1399_v25 = vpack.c.bf16 %v1537_v18, %v1536_v19 }
 0x24a   : > { %v1540_v24 = vpop.permute.xlu0 %1539 }
 0x24b   : > { %v1542_v26 = vunpack.i.h.bf16 %v1540_v24  ;;  %v1541_v27 = vunpack.i.l.bf16 %v1540_v24  ;;  %1395 = vmatprep.subr.msk.bf16.mxu1 %vm1966_vm3, %v1393_v23 }
 0x24c   : > { %1398 = vmatpush3.bf16.msk.msra.mxu1 %vm1966_vm3, %v1393_v23 }
 0x24d   : > { %1401 = vmatprep.subr.msk.bf16.mxu1 %vm1974_vm5, %v1399_v25  ;;  %v1405_v30 = vpack.c.bf16 %v1542_v26, %v1541_v27 }
 0x24f   : > { %1328 = vmatmul.mubr.msk.f32.vlgmr.msra.gmra.mrb[0].mxu1 %vm323_vm0, %v693_v28 }
 0x250   : > { %1404 = vmatpush3.bf16.msk.msra.mxu1 %vm1974_vm5, %v1399_v25  ;;  %1330 = vmatprep.mubr.msk.f32.mxu1 %vm323_vm0, %v694_v29 }
 0x251   : > { %1407 = vmatprep.subr.msk.bf16.mxu1 %vm1974_vm5, %v1405_v30 }
 0x253   : > { %1331 = vmatmul.mubr.msk.f32.gmra.mrb[2].mxu1 %vm323_vm0, %v695_v31 }
 0x254   : > { %1410 = vmatpush3.bf16.msk.msra.mxu1 %vm1974_vm5, %v1405_v30  ;;  %1341 = vmatprep.mubr.msk.f32.mxu1 %vm323_vm0, %v896_v32 }
 0x257   : > { %1342 = vmatmul.mubr.msk.f32.vlgmr.msra.gmra.mrb[0].mxu1 %vm323_vm0, %v897_v22  ;;  %v1008_v37 = vpop.permute.xlu1 %1007 }
 0x258   : > { %1344 = vmatprep.mubr.msk.f32.mxu1 %vm323_vm0, %v898_v33 }
 0x25b   : > { %1345 = vmatmul.mubr.msk.f32.gmra.mrb[2].mxu1 %vm323_vm0, %v899_v35  ;;  %v1013_v36 = vpop.permute.xlu0 %1012  ;;  %v1018_v45 = vpop.permute.xlu1 %1017 }
 0x25f   : > { %v1023_v42 = vpop.permute.xlu0 %1022 }
 0x32a   : > { %v1343_v38 = vpop.f32.mrb[0].mxu1 }
 0x32b   : > { %v1026_v39 = vadd.f32 %v1343_v38, %v1013_v36  ;;  %v978_v40 = vpop.f32.mrb[1].mxu1 }
 0x32c   : > { %v1025_v34 = vadd.f32 %v1008_v37, %v978_v40 }
 0x32d   : > { %v1030_v41 = vadd.f32 %v1026_v39, %v1931_v1 }
 0x32e   : > { %v1029_v43 = vadd.f32 %v1025_v34, %v1929_v0  ;;  %v1346_v44 = vpop.f32.mrb[2].mxu1 }
 0x32f   : > { %v1034_v46 = vmax.f32 %v1030_v41, 0.0  ;;  %v1028_v47 = vadd.f32 %v1346_v44, %v1023_v42  ;;  %v988_v48 = vpop.f32.mrb[3].mxu1 }
 0x330   : > { %v1033_v49 = vmax.f32 %v1029_v43, 0.0  ;;  %v1027_v50 = vadd.f32 %v1018_v45, %v988_v48 }
 0x331   : > { %1038 = vst [vmem:[%s271_s26 + $0x8] sm:$0xff] %v1034_v46  ;;  %v1032_v51 = vadd.f32 %v1028_v47, %v1937_v4 }
 0x332   : > { %1037 = vst [vmem:[%s271_s26] sm:$0xff] %v1033_v49  ;;  %v1031_v0 = vadd.f32 %v1027_v50, %v1933_v2 }
 0x333   : > { %v1036_v1 = vmax.f32 %v1032_v51, 0.0 }
 0x334   : > { %v1035_v52 = vmax.f32 %v1031_v0, 0.0 }
 0x335   : > { %1040 = vst [vmem:[%s271_s26 + $0x18] sm:$0xff] %v1036_v1 }
 0x336   : > { %1039 = vst [vmem:[%s271_s26 + $0x10] sm:$0xff] %v1035_v52 }
 0x337   : > { %1642 = shalt.err (!%p1639_p7)
}
 0x338   : > { %s1643_s12 = scalar_lea.hbm %s2053_s30, 512  ;;  %s1647_s24 = scalar_lea.hbm %s2101_s5, 2048 }
 0x339   : > { %p1644_p9 = scmp.ne.s32.totalorder %s2053_s30, %s1643_s12  ;;  %p1648_p5 = scmp.lt.u32.totalorder %s2053_s30, %s2101_s5 }
 0x33a   : > { %p1649_p10 = scmp.lt.u32.totalorder %s1647_s24, %s1643_s12  ;;  %p1651_p2 = scmp.lt.u32.totalorder %s1643_s12, %s2053_s30 }
 0x33b   : > { %p1645_p12 = pnand %p1644_p9, %p1860_p6 }
 0x33c   : > { %p1650_p1 = por %p1649_p10, %p1648_p5 }
 0x33d   : > { %p1646_p0 = pneg %p1645_p12 }
 0x33e   : > { %p1652_p4 = por %p1651_p2, %p1650_p1 }
 0x340   : > { %p1653_p8 = pnand %p1652_p4, %p1646_p0 }
 0x342   : > { %1656 = shalt.err (!%p1653_p8)
}
 0x343   : > { %s1710_s13 = smov 128   ;;  %s1711_s6 = smov 8  }
 0x344   : > { %1437 = dma.vmem_to_hbm [thread:$0]  (%p1860_p6), %s2047_s28, 512, %s2053_s30, %s1042_s22, %s1710_s13, %s1710_s13, %s1711_s6  }
 0x345 PF: > { %p1459_p11 = scmp.ge.s32.totalorder %s1699_s21, 2  ;;  %s1070_s9 = sand.u32 1, %s1687_s18  }
 0x346   : > { %p2120_p13 = scmp.ne.s32.totalorder %s2106_s25, 0  ;;  %s1071_s11 = scalar_lea.sflag [#allocation4], %s1070_s9 }
 0x348   : > { %p1451_p3 = pnand %p1459_p11, %p2120_p13 }
 0x34a   : > { %1682 = dma.done.wait (!%p1451_p3), %s1071_s11, 512  }
 0x34b   : > { %1684 = vsyncadd (!%p1451_p3), %s1071_s11, 4294966784  ;;  %p19_p7 = scmp.ge.s32.totalorder %s1850_s29, 6   ;;  %s2121_s18 = smov %s1691_s19 }
 0x34c   : > { %s2122_s19 = smov %s1695_s20  ;;  %s2123_s20 = smov %s1866_s27 }
 0x34d   : > { %s2124_s21 = smov %s1850_s29  ;;  %21 = sbr.rel (!%p19_p7) target bundleno = 6 (0x6), region = 97 }
 0x354   :  { %1076 = vsyncpa [#allocation3], 1 }
 0x355   :  { %1078 = vsyncpa [#allocation3 + $0x1], 1 }
 0x356   :  { %1079 = vsyncpa [#allocation6], 1 }
 0x357   :  { %1080 = vsyncpa [#allocation4], 1 }
 0x358   :  { %1082 = vsyncpa [#allocation4 + $0x1], 1 }

</bundles_post_ra>
